<compile_context>
chip_gen: v6e
topology: v6e:2x2x1
jax: 0.10.0
libtpu: 0.0.40
codegen_flags: <defaults>
</compile_context>

<pallas_src>
import functools

import jax
import jax.numpy as jnp
from jax.experimental import pallas as pl
from jax.experimental.pallas import tpu as pltpu


def _vq_kernel(x_ref, emb2_ref, e_sq_ref, embt_ref,
               q_ref, idx_ref, sse_ref, cnt_ref, *, hw_valid):
    # x_ref:    [BB, D, T]  input tile (channels on sublanes, spatial on lanes)
    # emb2_ref: [K, D]      2 * codebook (resident across the grid)
    # e_sq_ref: [K, 1]      ||e_k||^2 (resident)
    # embt_ref: [D, K]      codebook transposed (resident), for the quantize matmul
    # q_ref:    [BB, D, T]  quantized tile
    # idx_ref:  [BB, 1, T]  int32 code index per spatial position
    # sse_ref:  [1, 1]      per batch-group sum of squared (q - x), acc. over t
    # cnt_ref:  [K, 1]      per batch-group per-code counts, acc. over t
    bb, d_dim, t_dim = x_ref.shape
    k_dim = emb2_ref.shape[0]

    # Start of this batch-group's reduction over spatial tiles: zero the
    # accumulators living in the (resident) per-group output blocks.
    @pl.when(pl.program_id(1) == 0)
    def _init():
        sse_ref[...] = jnp.zeros_like(sse_ref)
        cnt_ref[...] = jnp.zeros_like(cnt_ref)

    emb2 = emb2_ref[...]           # [K, D]
    e_sq = e_sq_ref[...]           # [K, 1]
    embt = embt_ref[...]           # [D, K]
    iota_k = jax.lax.broadcasted_iota(jnp.int32, (k_dim, t_dim), 0)

    # Static: does the padded lane axis contain invalid tail positions?
    padded = (hw_valid % t_dim) != 0
    if padded:
        pos = (pl.program_id(1) * t_dim
               + jax.lax.broadcasted_iota(jnp.int32, (1, t_dim), 1))
        valid = (pos < hw_valid).astype(jnp.float32)          # [1, T]

    sse_acc = jnp.zeros((1, 1), jnp.float32)
    cnt_acc = jnp.zeros((k_dim, 1), jnp.float32)

    for b in range(bb):            # bb is small and static
        x = x_ref[b]               # [D, T]

        # scores[k, c] = ||e_k||^2 - 2 <e_k, x_c>   (||x_c||^2 dropped: it is
        # constant in k and cannot change the argmin).  D broadcasted VPU FMAs.
        scores = e_sq - emb2[:, 0:1] * x[0:1, :]
        for d in range(1, d_dim):
            scores = scores - emb2[:, d:d + 1] * x[d:d + 1, :]   # [K, T]

        # argmin with first-index tie-break (matches torch.argmin), int32 only.
        smin = jnp.min(scores, axis=0, keepdims=True)            # [1, T]
        cand = jnp.where(scores == smin, iota_k, k_dim)          # [K, T] int32
        idx = jnp.min(cand, axis=0, keepdims=True)               # [1, T] int32
        idx_ref[b] = idx

        enc = (cand == idx).astype(jnp.float32)                  # [K, T] one-hot

        # quantized[d, c] = emb[idx_c, d] == emb^T @ enc (one small MXU matmul;
        # HIGHEST keeps the codebook values exact in f32).
        q = jnp.dot(embt, enc,
                    precision=jax.lax.Precision.HIGHEST,
                    preferred_element_type=jnp.float32)          # [D, T]
        q_ref[b] = q

        diff = q - x
        if padded:
            diff = diff * valid
            cnt_acc = cnt_acc + jnp.sum(enc * valid, axis=1, keepdims=True)
        else:
            cnt_acc = cnt_acc + jnp.sum(enc, axis=1, keepdims=True)
        sse_acc = sse_acc + jnp.sum(diff * diff, keepdims=True)  # [1, 1]

    sse_ref[...] += sse_acc
    cnt_ref[...] += cnt_acc


def _choose_tiling(B, D, K, hw_pad, vmem_budget=28 * 1024 * 1024):
    """Pick (spatial tile, batches-per-step) under a conservative VMEM budget."""

    def est_bytes(tile, bb):
        # double-buffered pipeline blocks (x, q, idx) + [K,T]/[D,T] temporaries
        blocks = 2 * (2 * bb * D * tile + bb * tile) * 4
        temps = 6 * K * tile * 4 + 3 * D * tile * 4
        return blocks + temps

    tile = 128  # hw_pad is a multiple of 128, so 128 always divides it
    for t in (8192, 4096, 2048, 1024, 512, 256, 128):
        if hw_pad % t == 0 and est_bytes(t, 1) <= vmem_budget:
            tile = t
            break

    # If a single tile already covers the image, pack several images per grid
    # step to amortize per-step overhead, but keep >= 2 parallel batch groups
    # (v7x megacore) whenever B >= 2.
    bb = 1
    if hw_pad // tile == 1 and B > 1:
        max_bb = max(1, 2048 // tile)
        for cand in range(min(B, max_bb), 0, -1):
            if B % cand == 0 and B // cand >= 2 and est_bytes(tile, cand) <= vmem_budget:
                bb = cand
                break
    return tile, bb


def vq_ema_forward(x_nchw, embedding, commitment_cost=0.25,
                   return_encodings=True):
    """Matches VectorQuantizerEMA.forward output semantics.

    Returns (loss, quantized_NCHW, perplexity, encodings[N, K] or None).
    """
    B, C, H, W = x_nchw.shape
    K, D = embedding.shape
    assert C == D, "channel dim must equal embedding_dim"
    HW = H * W
    N = B * HW

    # Channels-minor view: no HBM transpose passes on input or output.
    x = x_nchw.astype(jnp.float32).reshape(B, D, HW)
    emb = embedding.astype(jnp.float32)

    # Keep the lane axis dense: pad H*W up to a multiple of 128 if necessary
    # (the kernel masks the tail positions out of sse / counts).
    hw_pad = ((HW + 127) // 128) * 128
    if hw_pad != HW:
        x = jnp.pad(x, ((0, 0), (0, 0), (0, hw_pad - HW)))

    tile, bb = _choose_tiling(B, D, K, hw_pad)
    n_t = hw_pad // tile
    n_b = B // bb
    grid = (n_b, n_t)

    # Codebook-derived constants hoisted out of the per-step body.
    emb2 = 2.0 * emb                                      # [K, D]
    e_sq = jnp.sum(emb * emb, axis=1, keepdims=True)      # [K, 1]
    embt = emb.T                                          # [D, K]

    kernel = functools.partial(_vq_kernel, hw_valid=HW)

    q, idx, sse_parts, cnt_parts = pl.pallas_call(
        kernel,
        grid=grid,
        in_specs=[
            pl.BlockSpec((bb, D, tile), lambda b, t: (b, 0, t)),
            pl.BlockSpec((K, D), lambda b, t: (0, 0)),
            pl.BlockSpec((K, 1), lambda b, t: (0, 0)),
            pl.BlockSpec((D, K), lambda b, t: (0, 0)),
        ],
        out_specs=(
            pl.BlockSpec((bb, D, tile), lambda b, t: (b, 0, t)),
            pl.BlockSpec((bb, 1, tile), lambda b, t: (b, 0, t)),
            pl.BlockSpec((None, 1, 1), lambda b, t: (b, 0, 0)),
            pl.BlockSpec((None, K, 1), lambda b, t: (b, 0, 0)),
        ),
        out_shape=(
            jax.ShapeDtypeStruct((B, D, hw_pad), jnp.float32),  # quantized
            jax.ShapeDtypeStruct((B, 1, hw_pad), jnp.int32),    # code indices
            jax.ShapeDtypeStruct((n_b, 1, 1), jnp.float32),     # partial SSE
            jax.ShapeDtypeStruct((n_b, K, 1), jnp.float32),     # partial counts
        ),
        compiler_params=pltpu.CompilerParams(
            dimension_semantics=("parallel", "arbitrary"),
            vmem_limit_bytes=48 * 1024 * 1024),
    )(x, emb2, e_sq, embt)

    if hw_pad != HW:
        q = q[:, :, :HW]
        idx = idx[:, :, :HW]

    # Finish the tiny reductions / transcendentals in plain JAX.
    loss = commitment_cost * jnp.sum(sse_parts) / jnp.float32(N * D)
    quantized = q.reshape(B, D, H, W)                     # already NCHW
    counts = jnp.sum(cnt_parts[:, :, 0], axis=0)          # [K]
    avg_probs = counts / jnp.float32(N)
    perplexity = jnp.exp(-jnp.sum(avg_probs * jnp.log(avg_probs + 1e-10)))

    encodings = None
    if return_encodings:
        # Dense [N, K] one-hot only because the module API returns it; rows are
        # in (b, h, w) order, same as the NHWC flatten in the PyTorch module.
        encodings = jax.nn.one_hot(idx.reshape(-1), K, dtype=jnp.float32)

    # Straight-through estimator: forward value equals quantized.
    return loss, quantized, perplexity, encodings


if __name__ == "__main__":
    num_embeddings = 32
    embedding_dim = 4
    commitment_cost = 0.25

    key = jax.random.PRNGKey(0)
    k_x, k_emb = jax.random.split(key)
    x = jax.random.normal(k_x, (2, embedding_dim, 16, 16), dtype=jnp.float32)
    embedding_weight = jax.random.normal(
        k_emb, (num_embeddings, embedding_dim), dtype=jnp.float32)

    loss, quantized, perplexity, encodings = vq_ema_forward(
        x, embedding_weight, commitment_cost)
    jax.block_until_ready((loss, quantized, perplexity, encodings))

    # Shape checks.
    assert quantized.shape == x.shape
    assert encodings.shape == (2 * 16 * 16, num_embeddings)

    # Internal consistency: quantized must equal the codebook rows selected by
    # the returned encodings (exact gather reference, tie-break independent).
    enc_idx = jnp.argmax(encodings, axis=1)
    q_from_enc = embedding_weight[enc_idx].reshape(
        2, 16, 16, embedding_dim).transpose(0, 3, 1, 2)
    assert jnp.allclose(quantized, q_from_enc, atol=2e-2)

    # Check against an exact (element-wise, matmul-free) plain-JAX reference.
    flat = jnp.transpose(x, (0, 2, 3, 1)).reshape(-1, embedding_dim)
    d_ref = jnp.sum(
        (flat[:, None, :] - embedding_weight[None, :, :]) ** 2, axis=-1)
    idx_ref = jnp.argmin(d_ref, axis=1)
    enc_ref = jax.nn.one_hot(idx_ref, num_embeddings, dtype=jnp.float32)
    q_ref = embedding_weight[idx_ref]
    loss_ref = commitment_cost * jnp.mean((q_ref - flat) ** 2)
    avg_ref = jnp.mean(enc_ref, axis=0)
    perp_ref = jnp.exp(-jnp.sum(avg_ref * jnp.log(avg_ref + 1e-10)))

    assert jnp.allclose(loss, loss_ref, rtol=2e-2, atol=1e-5)
    assert jnp.allclose(perplexity, perp_ref, rtol=5e-2)

    print("KERNEL_OK")
</pallas_src>

<mosaic_0001>
module attributes {stable_mosaic.version = 11 : i64} {
  func.func @_vq_kernel(%arg0: i32, %arg1: i32, %arg2: memref<1x4x256xf32, #tpu.memory_space<vmem>>, %arg3: memref<32x4xf32, #tpu.memory_space<vmem>>, %arg4: memref<32x1xf32, #tpu.memory_space<vmem>>, %arg5: memref<4x32xf32, #tpu.memory_space<vmem>>, %arg6: memref<1x4x256xf32, #tpu.memory_space<vmem>>, %arg7: memref<1x1x256xi32, #tpu.memory_space<vmem>>, %arg8: memref<1x1x1xf32, #tpu.memory_space<vmem>>, %arg9: memref<1x32x1xf32, #tpu.memory_space<vmem>>) attributes {dimension_semantics = [#tpu.dimension_semantics<parallel>, #tpu.dimension_semantics<arbitrary>], iteration_bounds = array<i64: 2, 1>, scalar_prefetch = 0 : i64, scratch_operands = 0 : i64, tpu.core_type = #tpu.core_type<tc>, window_params = [{transform_indices = @transform_0, window_bounds = array<i64: 1, 4, 256>}, {pipeline_mode = #tpu.pipeline_mode<synchronous>, transform_indices = @transform_1, window_bounds = array<i64: 32, 4>}, {pipeline_mode = #tpu.pipeline_mode<synchronous>, transform_indices = @transform_2, window_bounds = array<i64: 32, 1>}, {pipeline_mode = #tpu.pipeline_mode<synchronous>, transform_indices = @transform_3, window_bounds = array<i64: 4, 32>}, {transform_indices = @transform_4, window_bounds = array<i64: 1, 4, 256>}, {transform_indices = @transform_5, window_bounds = array<i64: 1, 1, 256>}, {transform_indices = @transform_6, window_bounds = array<i64: 1, 1, 1>}, {transform_indices = @transform_7, window_bounds = array<i64: 1, 32, 1>}]} {
    %c0_i32 = arith.constant 0 : i32
    %0 = arith.cmpi eq, %arg1, %c0_i32 : i32
    %1 = arith.extui %0 : i1 to i32
    %c0_i32_0 = arith.constant 0 : i32
    %2 = arith.cmpi ne, %1, %c0_i32_0 : i32
    scf.if %2 {
      %cst_33 = arith.constant 0.000000e+00 : f32
      %78 = vector.broadcast %cst_33 : f32 to vector<1x1xf32>
      %c0_34 = arith.constant 0 : index
      %c0_35 = arith.constant 0 : index
      %c0_36 = arith.constant 0 : index
      %79 = vector.load %arg8[%c0_34, %c0_35, %c0_36] : memref<1x1x1xf32, #tpu.memory_space<vmem>>, vector<1x1x1xf32>
      %80 = vector.shape_cast %79 : vector<1x1x1xf32> to vector<1x1xf32>
      %81 = vector.shape_cast %78 : vector<1x1xf32> to vector<1x1x1xf32>
      tpu.vector_store %arg8[%c0_34, %c0_35, %c0_36], %81 {strides = array<i32>} : memref<1x1x1xf32, #tpu.memory_space<vmem>>, vector<1x1x1xf32>,
      %cst_37 = arith.constant 0.000000e+00 : f32
      %82 = vector.broadcast %cst_37 : f32 to vector<32x1xf32>
      %c0_38 = arith.constant 0 : index
      %c0_39 = arith.constant 0 : index
      %c0_40 = arith.constant 0 : index
      %83 = vector.load %arg9[%c0_38, %c0_39, %c0_40] : memref<1x32x1xf32, #tpu.memory_space<vmem>>, vector<1x32x1xf32>
      %84 = vector.shape_cast %83 : vector<1x32x1xf32> to vector<32x1xf32>
      %85 = vector.shape_cast %82 : vector<32x1xf32> to vector<1x32x1xf32>
      tpu.vector_store %arg9[%c0_38, %c0_39, %c0_40], %85 {strides = array<i32>} : memref<1x32x1xf32, #tpu.memory_space<vmem>>, vector<1x32x1xf32>,
    } else {
    }
    %c0 = arith.constant 0 : index
    %c0_1 = arith.constant 0 : index
    %3 = vector.load %arg3[%c0, %c0_1] : memref<32x4xf32, #tpu.memory_space<vmem>>, vector<32x4xf32>
    %c0_2 = arith.constant 0 : index
    %c0_3 = arith.constant 0 : index
    %4 = vector.load %arg4[%c0_2, %c0_3] : memref<32x1xf32, #tpu.memory_space<vmem>>, vector<32x1xf32>
    %c0_4 = arith.constant 0 : index
    %c0_5 = arith.constant 0 : index
    %5 = vector.load %arg5[%c0_4, %c0_5] : memref<4x32xf32, #tpu.memory_space<vmem>>, vector<4x32xf32>
    %6 = tpu.iota {dimensions = array<i32: 0>} : vector<32x256xi32>
    %cst = arith.constant 0.000000e+00 : f32
    %7 = vector.broadcast %cst : f32 to vector<1x1xf32>
    %cst_6 = arith.constant 0.000000e+00 : f32
    %8 = vector.broadcast %cst_6 : f32 to vector<32x1xf32>
    %c0_7 = arith.constant 0 : index
    %c0_8 = arith.constant 0 : index
    %c0_9 = arith.constant 0 : index
    %9 = vector.load %arg2[%c0_7, %c0_8, %c0_9] : memref<1x4x256xf32, #tpu.memory_space<vmem>>, vector<1x4x256xf32>
    %10 = vector.shape_cast %9 : vector<1x4x256xf32> to vector<4x256xf32>
    %11 = vector.extract_strided_slice %3 {offsets = [0, 0], sizes = [32, 1], strides = [1, 1]} : vector<32x4xf32> to vector<32x1xf32>
    %12 = vector.extract_strided_slice %10 {offsets = [0, 0], sizes = [1, 256], strides = [1, 1]} : vector<4x256xf32> to vector<1x256xf32>
    %13 = vector.broadcast %11 : vector<32x1xf32> to vector<32x256xf32>
    %14 = vector.broadcast %12 : vector<1x256xf32> to vector<32x256xf32>
    %15 = arith.mulf %13, %14 : vector<32x256xf32>
    %16 = vector.broadcast %4 : vector<32x1xf32> to vector<32x256xf32>
    %17 = arith.subf %16, %15 : vector<32x256xf32>
    %18 = vector.extract_strided_slice %3 {offsets = [0, 1], sizes = [32, 1], strides = [1, 1]} : vector<32x4xf32> to vector<32x1xf32>
    %19 = vector.extract_strided_slice %10 {offsets = [1, 0], sizes = [1, 256], strides = [1, 1]} : vector<4x256xf32> to vector<1x256xf32>
    %20 = vector.broadcast %18 : vector<32x1xf32> to vector<32x256xf32>
    %21 = vector.broadcast %19 : vector<1x256xf32> to vector<32x256xf32>
    %22 = arith.mulf %20, %21 : vector<32x256xf32>
    %23 = arith.subf %17, %22 : vector<32x256xf32>
    %24 = vector.extract_strided_slice %3 {offsets = [0, 2], sizes = [32, 1], strides = [1, 1]} : vector<32x4xf32> to vector<32x1xf32>
    %25 = vector.extract_strided_slice %10 {offsets = [2, 0], sizes = [1, 256], strides = [1, 1]} : vector<4x256xf32> to vector<1x256xf32>
    %26 = vector.broadcast %24 : vector<32x1xf32> to vector<32x256xf32>
    %27 = vector.broadcast %25 : vector<1x256xf32> to vector<32x256xf32>
    %28 = arith.mulf %26, %27 : vector<32x256xf32>
    %29 = arith.subf %23, %28 : vector<32x256xf32>
    %30 = vector.extract_strided_slice %3 {offsets = [0, 3], sizes = [32, 1], strides = [1, 1]} : vector<32x4xf32> to vector<32x1xf32>
    %31 = vector.extract_strided_slice %10 {offsets = [3, 0], sizes = [1, 256], strides = [1, 1]} : vector<4x256xf32> to vector<1x256xf32>
    %32 = vector.broadcast %30 : vector<32x1xf32> to vector<32x256xf32>
    %33 = vector.broadcast %31 : vector<1x256xf32> to vector<32x256xf32>
    %34 = arith.mulf %32, %33 : vector<32x256xf32>
    %35 = arith.subf %29, %34 : vector<32x256xf32>
    %cst_10 = arith.constant dense<0x7F800000> : vector<256xf32>
    %36 = vector.multi_reduction <minimumf>, %35, %cst_10 [0] : vector<32x256xf32> to vector<256xf32>
    %37 = vector.shape_cast %36 : vector<256xf32> to vector<1x256xf32>
    %38 = vector.broadcast %37 : vector<1x256xf32> to vector<32x256xf32>
    %39 = arith.cmpf oeq, %35, %38 : vector<32x256xf32>
    %c32_i32 = arith.constant 32 : i32
    %40 = vector.broadcast %c32_i32 : i32 to vector<32x256xi32>
    %41 = arith.select %39, %6, %40 : vector<32x256xi1>, vector<32x256xi32>
    %cst_11 = arith.constant dense<2147483647> : vector<256xi32>
    %42 = vector.multi_reduction <minsi>, %41, %cst_11 [0] : vector<32x256xi32> to vector<256xi32>
    %43 = vector.shape_cast %42 : vector<256xi32> to vector<1x256xi32>
    %c0_12 = arith.constant 0 : index
    %c0_13 = arith.constant 0 : index
    %c0_14 = arith.constant 0 : index
    %44 = vector.load %arg7[%c0_12, %c0_13, %c0_14] : memref<1x1x256xi32, #tpu.memory_space<vmem>>, vector<1x1x256xi32>
    %45 = vector.shape_cast %44 : vector<1x1x256xi32> to vector<1x256xi32>
    %46 = vector.shape_cast %43 : vector<1x256xi32> to vector<1x1x256xi32>
    tpu.vector_store %arg7[%c0_12, %c0_13, %c0_14], %46 {strides = array<i32>} : memref<1x1x256xi32, #tpu.memory_space<vmem>>, vector<1x1x256xi32>,
    %47 = vector.broadcast %43 : vector<1x256xi32> to vector<32x256xi32>
    %48 = arith.cmpi eq, %41, %47 : vector<32x256xi32>
    %49 = arith.extui %48 : vector<32x256xi1> to vector<32x256xi32>
    %50 = arith.sitofp %49 : vector<32x256xi32> to vector<32x256xf32>
    %cst_15 = arith.constant dense<0.000000e+00> : vector<4x256xf32>
    %51 = tpu.matmul %5, %50, %cst_15 {dimension_numbers = #tpu.dot_dimension_numbers<[1], [0], [0], [1], [0, 0, 1, 1], [], []>, precision = #tpu.contract_precision<fp32>} : vector<4x32xf32>, vector<32x256xf32>, vector<4x256xf32> -> vector<4x256xf32>
    %c0_16 = arith.constant 0 : index
    %c0_17 = arith.constant 0 : index
    %c0_18 = arith.constant 0 : index
    %52 = vector.load %arg6[%c0_16, %c0_17, %c0_18] : memref<1x4x256xf32, #tpu.memory_space<vmem>>, vector<1x4x256xf32>
    %53 = vector.shape_cast %52 : vector<1x4x256xf32> to vector<4x256xf32>
    %54 = vector.shape_cast %51 : vector<4x256xf32> to vector<1x4x256xf32>
    tpu.vector_store %arg6[%c0_16, %c0_17, %c0_18], %54 {strides = array<i32>} : memref<1x4x256xf32, #tpu.memory_space<vmem>>, vector<1x4x256xf32>,
    %55 = arith.subf %51, %10 : vector<4x256xf32>
    %cst_19 = arith.constant dense<0.000000e+00> : vector<32xf32>
    %56 = vector.multi_reduction <add>, %50, %cst_19 [1] : vector<32x256xf32> to vector<32xf32>
    %57 = vector.shape_cast %56 : vector<32xf32> to vector<32x1xf32>
    %58 = arith.addf %8, %57 : vector<32x1xf32>
    %59 = arith.mulf %55, %55 : vector<4x256xf32>
    %60 = vector.shape_cast %59 : vector<4x256xf32> to vector<1x4x256xf32>
    %cst_20 = arith.constant dense<0.000000e+00> : vector<1xf32>
    %61 = vector.multi_reduction <add>, %60, %cst_20 [1, 2] : vector<1x4x256xf32> to vector<1xf32>
    %62 = vector.shape_cast %61 : vector<1xf32> to vector<1x1x1xf32>
    %63 = vector.extract %62[0, 0, 0] : f32 from vector<1x1x1xf32>
    %64 = vector.broadcast %63 : f32 to vector<1x1xf32>
    %65 = arith.addf %7, %64 : vector<1x1xf32>
    %c0_21 = arith.constant 0 : index
    %c0_22 = arith.constant 0 : index
    %c0_23 = arith.constant 0 : index
    %66 = vector.load %arg8[%c0_21, %c0_22, %c0_23] : memref<1x1x1xf32, #tpu.memory_space<vmem>>, vector<1x1x1xf32>
    %67 = vector.shape_cast %66 : vector<1x1x1xf32> to vector<1x1xf32>
    %68 = arith.addf %67, %65 : vector<1x1xf32>
    %c0_24 = arith.constant 0 : index
    %c0_25 = arith.constant 0 : index
    %c0_26 = arith.constant 0 : index
    %69 = vector.load %arg8[%c0_24, %c0_25, %c0_26] : memref<1x1x1xf32, #tpu.memory_space<vmem>>, vector<1x1x1xf32>
    %70 = vector.shape_cast %69 : vector<1x1x1xf32> to vector<1x1xf32>
    %71 = vector.shape_cast %68 : vector<1x1xf32> to vector<1x1x1xf32>
    tpu.vector_store %arg8[%c0_24, %c0_25, %c0_26], %71 {strides = array<i32>} : memref<1x1x1xf32, #tpu.memory_space<vmem>>, vector<1x1x1xf32>,
    %c0_27 = arith.constant 0 : index
    %c0_28 = arith.constant 0 : index
    %c0_29 = arith.constant 0 : index
    %72 = vector.load %arg9[%c0_27, %c0_28, %c0_29] : memref<1x32x1xf32, #tpu.memory_space<vmem>>, vector<1x32x1xf32>
    %73 = vector.shape_cast %72 : vector<1x32x1xf32> to vector<32x1xf32>
    %74 = arith.addf %73, %58 : vector<32x1xf32>
    %c0_30 = arith.constant 0 : index
    %c0_31 = arith.constant 0 : index
    %c0_32 = arith.constant 0 : index
    %75 = vector.load %arg9[%c0_30, %c0_31, %c0_32] : memref<1x32x1xf32, #tpu.memory_space<vmem>>, vector<1x32x1xf32>
    %76 = vector.shape_cast %75 : vector<1x32x1xf32> to vector<32x1xf32>
    %77 = vector.shape_cast %74 : vector<32x1xf32> to vector<1x32x1xf32>
    tpu.vector_store %arg9[%c0_30, %c0_31, %c0_32], %77 {strides = array<i32>} : memref<1x32x1xf32, #tpu.memory_space<vmem>>, vector<1x32x1xf32>,
    return
  }
  func.func @transform_0(%arg0: i32, %arg1: i32) -> (i32, i32, i32) {
    %c0_i32 = arith.constant 0 : i32
    %c0_i32_0 = arith.constant 0 : i32
    return %arg0, %c0_i32, %arg1 : i32, i32, i32
  }
  func.func @transform_1(%arg0: i32, %arg1: i32) -> (i32, i32) {
    %c0_i32 = arith.constant 0 : i32
    %c0_i32_0 = arith.constant 0 : i32
    %c0_i32_1 = arith.constant 0 : i32
    return %c0_i32, %c0_i32_0 : i32, i32
  }
  func.func @transform_2(%arg0: i32, %arg1: i32) -> (i32, i32) {
    %c0_i32 = arith.constant 0 : i32
    %c0_i32_0 = arith.constant 0 : i32
    %c0_i32_1 = arith.constant 0 : i32
    return %c0_i32, %c0_i32_0 : i32, i32
  }
  func.func @transform_3(%arg0: i32, %arg1: i32) -> (i32, i32) {
    %c0_i32 = arith.constant 0 : i32
    %c0_i32_0 = arith.constant 0 : i32
    %c0_i32_1 = arith.constant 0 : i32
    return %c0_i32, %c0_i32_0 : i32, i32
  }
  func.func @transform_4(%arg0: i32, %arg1: i32) -> (i32, i32, i32) {
    %c0_i32 = arith.constant 0 : i32
    %c0_i32_0 = arith.constant 0 : i32
    return %arg0, %c0_i32, %arg1 : i32, i32, i32
  }
  func.func @transform_5(%arg0: i32, %arg1: i32) -> (i32, i32, i32) {
    %c0_i32 = arith.constant 0 : i32
    %c0_i32_0 = arith.constant 0 : i32
    return %arg0, %c0_i32, %arg1 : i32, i32, i32
  }
  func.func @transform_6(%arg0: i32, %arg1: i32) -> (i32, i32, i32) {
    %c0_i32 = arith.constant 0 : i32
    %c0_i32_0 = arith.constant 0 : i32
    %c0_i32_1 = arith.constant 0 : i32
    return %arg0, %c0_i32, %c0_i32_0 : i32, i32, i32
  }
  func.func @transform_7(%arg0: i32, %arg1: i32) -> (i32, i32, i32) {
    %c0_i32 = arith.constant 0 : i32
    %c0_i32_0 = arith.constant 0 : i32
    %c0_i32_1 = arith.constant 0 : i32
    return %arg0, %c0_i32, %c0_i32_0 : i32, i32, i32
  }
}

</mosaic_0001>

<bundles_post_ra>
// kernel: tpu_custom_call.1
= control target key start
LH: loop header
LB: loop body
LE: loop exit
PB: predicated region body
PF: predicated region fallthrough
CT: control target
= control target key end

     0   :  { %s2302_s0 = inlined_call_operand.vmem [shape: f32[2,4,256], index: 0, kind: input, shape index: {}]   ;;  %s2303_s1 = inlined_call_operand.vmem [shape: f32[32,4], index: 1, kind: input, shape index: {}]   ;;  %s2304_s2 = inlined_call_operand.vmem [shape: f32[32,1], index: 2, kind: input, shape index: {}]   ;;  %s2305_s3 = inlined_call_operand.vmem [shape: f32[4,32], index: 3, kind: input, shape index: {}]   ;;  %s2306_s4 = inlined_call_operand.hbm [shape: f32[2,4,256], index: 4, kind: output, shape index: {0}]   ;;  %s2307_s5 = inlined_call_operand.hbm [shape: s32[2,1,256], index: 5, kind: output, shape index: {1}]   ;;  %s2308_s6 = inlined_call_operand.vmem [shape: f32[2,1,1], index: 6, kind: output, shape index: {2}]   ;;  %s2309_s7 = inlined_call_operand.vmem [shape: f32[2,32,1], index: 7, kind: output, shape index: {3}]  }
   0x1   :  { %2310 = sst [smem:[#allocation8_spill]] %s2302_s0 }
   0x2   :  { %2311 = sst [smem:[#allocation9_spill]] %s2303_s1 }
   0x3   :  { %2312 = sst [smem:[#allocation10_spill]] %s2304_s2 }
   0x4   :  { %2313 = sst [smem:[#allocation11_spill]] %s2305_s3 }
   0x5   :  { %13 = vsyncpa [#allocation3], 0 }
   0x6   :  { %15 = vsyncpa [#allocation3 + $0x1], 0 }
   0x7   :  { %16 = vsyncpa [#allocation5], 0 }
   0x8   :  { %18 = vsyncpa [#allocation5 + $0x1], 0  ;;  %s1803_s24 = smov 0   ;;  %s1805_s25 = smov 0  }
   0x9   :  { %s1807_s26 = smov 0   ;;  %s1809_s27 = smov 0  }
   0xa   :  { %s1811_s28 = smov 0   ;;  %s1813_s29 = smov 0  }
   0xb LB: > { %s1514_s30 = sadd.s32 4294967295, %s1752_s29   ;;  %s1515_s8 = sadd.s32 4294967294, %s1752_s29   ;;  %s1752_s29 = sphi %s1813_s29, %s24_s29   ;;  %s1748_s28 = sphi %s1811_s28, %s2324_s28   ;;  %s1744_s27 = sphi %s1809_s27, %s2323_s27   ;;  %s1740_s26 = sphi %s1807_s26, %s2322_s26   ;;  %s1736_s25 = sphi %s1805_s25, %s2321_s25   ;;  %s1732_s24 = sphi %s1803_s24, %s2320_s24  }
   0xc   : > { %s36_s9 = sadd.s32 1, %s1748_s28  ;;  %s136_s10 = sadd.s32 1, %s1740_s26 }
   0xd   : > { %p38_p0 = scmp.ge.s32.totalorder %s36_s9, 2  ;;  %p146_p1 = scmp.ne.s32.totalorder %s1740_s26, %s1736_s25 }
   0xe   : > { %p147_p2 = scmp.eq.s32.totalorder %s1514_s30, 1  ;;  %p152_p3 = scmp.ne.s32.totalorder %s1736_s25, %s1732_s24 }
   0xf   : > { %s2326_s9 = smov (%p38_p0, %s36_s9), 0  ;;  %p153_p5 = scmp.eq.s32.totalorder %s1515_s8, 1 }
  0x10   : > { %p1843_p4 = por %p147_p2, %p146_p1  ;;  %s131_s12 = ssub.s32 %s1748_s28, %s2326_s9 }
  0x11   : > { %p1518_p6 = scmp.ge.s32.totalorder %s1752_s29, 1  ;;  %p134_p7 = scmp.eq.s32.totalorder %s131_s12, 0 }
  0x12   : > { %p1850_p8 = por %p153_p5, %p152_p3  ;;  %p273_p9 = scmp.lt.s32.totalorder %s1752_s29, 3 }
  0x13   : > { %s1856_s14 = scalar_select %p134_p7, %s1740_s26, %s136_s10  }
  0x14   : > { %p274_p10 = pnand %p1518_p6, %p273_p9 }
  0x15   : > { %s2316_s1 = sld [smem:[#allocation9_spill]] (!%p274_p10)  ;;  %p323_p11 = scmp.lt.s32.totalorder (!%p274_p10), %s1744_s27, 1 }
  0x16   : > { %277 = sbr.rel (%p274_p10) target bundleno = 682 (0x2aa), region = 36  ;;  %s2317_s2 = sld [smem:[#allocation10_spill]] (!%p274_p10) }
  0x17   : > { %s2318_s0 = sld [smem:[#allocation8_spill]] (!%p274_p10)  ;;  %s2110_s16 = sand.u32 (!%p274_p10), 1, %s1736_s25  }
  0x18   : > { %s2319_s3 = sld [smem:[#allocation11_spill]] (!%p274_p10)  ;;  %s1520_s17 = sshll.u32 (!%p274_p10), %s2110_s16, 1 }
  0x19   : > { %s1519_s20 = sshll.u32 (!%p274_p10), %s2110_s16, 3 }
  0x1a   : > { %s302_s21 = scalar_lea.vmem (!%p274_p10), [#allocation2], %s1519_s20 }
  0x1b   : > { %v355_v0 = vld [vmem:[%s2316_s1 + $0x10] sm:$0xff]  ;;  %v353_v1 = vld [vmem:[%s2316_s1] sm:$0xff]  ;;  %v1754_v2 = vmov 0   ;;  %v356_v3 = vld [vmem:[%s2316_s1 + $0x18] sm:$0xff]  ;;  %v1755_v9 = vmov 1   ;;  %v1756_v10 = vmov 2   ;;  %v362_v19 = vlaneseq }
  0x1c   : > { %1639 = vset.pattern.permute.xlu1 %v1754_v2  ;;  %1638 = vset.pattern.permute.xlu0 %v1754_v2  ;;  %v354_v4 = vld [vmem:[%s2316_s1 + $0x8] sm:$0xff]  ;;  %v357_v6 = vld [vmem:[%s2317_s2] sm:$0xff]  ;;  %v360_v7 = vld [vmem:[%s2317_s2 + $0x18] sm:$0xff]  ;;  %v1757_v11 = vmov 3   ;;  %v1758_v12 = vmov 0.0   ;;  %s1886_s18 = scalar_select %p323_p11, %s1744_s27, 1 }
  0x1d   : > { %380 = vperm.xlu1 %1639, %v355_v0   ;;  %370 = vperm.xlu0 %1638, %v353_v1   ;;  %v358_v5 = vld [vmem:[%s2317_s2 + $0x8] sm:$0xff]  ;;  %v359_v8 = vld [vmem:[%s2317_s2 + $0x10] sm:$0xff]  ;;  %vm348_vm0 = vcmask 7168   ;;  %v1916_v22 = vshrl.u32 %v362_v19, 7  ;;  %vm701_vm1 = vcmask 261120   ;;  %s1337_s20 = sshll.u32 %s302_s21, 4  ;;  %s1338_s20 = int_to_ptr.vmem [resolvable:$true] %s1337_s20 }
  0x1e   : > { %777 = vmatprep.mubr.f32.mxu0 %v1758_v12  ;;  %893 = vmatprep.mubr.f32.mxu1 %v1758_v12  ;;  %s1566_s19 = sshll.u32 %s1886_s18, 5  ;;  %s1565_s23 = sshll.u32 %s1886_s18, 3 }
  0x1f   : > { %s1892_s22 = scalar_lea.vmem %s2309_s7, %s1566_s19  ;;  %s330_s10 = scalar_lea.vmem %s2318_s0, %s1565_s23  ;;  %v391_v25 = vsub.s32 0, %v1916_v22  ;;  %v395_v26 = vsub.s32 4, %v1916_v22  ;;  %v461_v28 = vsub.s32 1, %v1916_v22  ;;  %v465_v29 = vsub.s32 5, %v1916_v22 }
  0x20   : > { %349 = vst.msk [vmem:[%s1892_s22] sm:$0xff] %vm348_vm0, %v1758_v12  ;;  %350 = vst.msk [vmem:[%s1892_s22 + $0x8] sm:$0xff] %vm348_vm0, %v1758_v12  ;;  %v1923_v27 = vld [vmem:[%s330_s10] sm:$0xff]  ;;  %v511_v32 = vsub.s32 2, %v1916_v22  ;;  %v515_v33 = vsub.s32 6, %v1916_v22  ;;  %v561_v36 = vsub.s32 3, %v1916_v22  ;;  %s2234_s8 = scalar_lea.vmem %s2308_s6, %s1886_s18 }
  0x21   : > { %385 = vperm.xlu1 %1639, %v356_v3   ;;  %375 = vperm.xlu0 %1638, %v354_v4   ;;  %351 = vst.msk [vmem:[%s1892_s22 + $0x10] sm:$0xff] %vm348_vm0, %v1758_v12  ;;  %352 = vst.msk [vmem:[%s1892_s22 + $0x18] sm:$0xff] %vm348_vm0, %v1758_v12  ;;  %v392_v34 = vrot.slane %v1923_v27, %v391_v25  ;;  %v396_v35 = vrot.slane %v1923_v27, %v395_v26  ;;  %v565_v37 = vsub.s32 7, %v1916_v22  ;;  %s2136_s19 = scalar_lea.vmem [#allocation4], %s1520_s17  ;;  %s1567_s10 = sshll.u32 %s1744_s27, 7 }
  0x22   : > { %v462_v38 = vrot.slane %v1923_v27, %v461_v28  ;;  %v466_v39 = vrot.slane %v1923_v27, %v465_v29  ;;  %v512_v41 = vrot.slane %v1923_v27, %v511_v32  ;;  %v516_v42 = vrot.slane %v1923_v27, %v515_v33  ;;  %s1335_s17 = scalar_lea.hbm %s2306_s4, %s1567_s10  ;;  %s1308_s0 = scalar_lea.sflag [#allocation3], %s2110_s16 }
  0x23   : > { %v402_v43 = vrot.slane %v392_v34, %v391_v25  ;;  %v406_v44 = vrot.slane %v396_v35, %v391_v25  ;;  %v562_v46 = vrot.slane %v1923_v27, %v561_v36  ;;  %v566_v47 = vrot.slane %v1923_v27, %v565_v37  ;;  %s1646_s1 = scalar_lea.vmem %s1338_s20, 128  ;;  %s1761_s18 = smov [#allocation2]  }
  0x24   : > { %v472_v48 = vrot.slane %v462_v38, %v461_v28  ;;  %v476_v49 = vrot.slane %v466_v39, %v461_v28  ;;  %v522_v54 = vrot.slane %v512_v41, %v511_v32  ;;  %v526_v55 = vrot.slane %v516_v42, %v511_v32  ;;  %p1647_p12 = scmp.ne.s32.totalorder %s1338_s20, %s1646_s1  ;;  %s1650_s23 = sshll.u32 %s1761_s18, 4  ;;  %s1651_s23 = int_to_ptr.vmem [resolvable:$false] %s1650_s23 }
  0x25   : > { %422 = vperm.xlu1 %1639, %v358_v5   ;;  %417 = vperm.xlu0 %1638, %v357_v6   ;;  %v572_v59 = vrot.slane %v562_v46, %v561_v36  ;;  %v576_v60 = vrot.slane %v566_v47, %v561_v36  ;;  %s1652_s30 = scalar_lea.vmem %s1651_s23, 256  ;;  %p1653_p1 = scmp.lt.s32.totalorder %s1338_s20, %s1651_s23 }
  0x26   : > { %p1648_p13 = pnand %p1647_p12, %p1843_p4  ;;  %p1654_p2 = scmp.lt.s32.totalorder %s1652_s30, %s1646_s1 }
  0x28   : > { %p1649_p0 = pneg %p1648_p13  ;;  %p1655_p3 = por %p1654_p2, %p1653_p1 }
  0x29   : > { %432 = vperm.xlu1 %1639, %v360_v7   ;;  %427 = vperm.xlu0 %1638, %v359_v8  }
  0x2a   : > { %p1656_p5 = pnand %p1655_p3, %p1649_p0 }
  0x2d   : > { %1641 = vset.pattern.permute.xlu1 %v1755_v9  ;;  %1640 = vset.pattern.permute.xlu0 %v1755_v9 }
  0x2e   : > { %448 = vperm.xlu1 %1641, %v354_v4   ;;  %444 = vperm.xlu0 %1640, %v353_v1  }
  0x32   : > { %452 = vperm.xlu1 %1641, %v355_v0   ;;  %456 = vperm.xlu0 %1640, %v356_v3  }
  0x36   : > { %1642 = vset.pattern.permute.xlu1 %v1756_v10  ;;  %1643 = vset.pattern.permute.xlu0 %v1756_v10 }
  0x37   : > { %494 = vperm.xlu1 %1642, %v353_v1   ;;  %498 = vperm.xlu0 %1643, %v354_v4  }
  0x3b   : > { %502 = vperm.xlu1 %1642, %v355_v0   ;;  %1644 = vset.pattern.permute.xlu0 %v1757_v11 }
  0x3c   : > { %544 = vperm.xlu0 %1644, %v353_v1  }
  0x3f   : > { %506 = vperm.xlu1 %1642, %v356_v3  }
  0x40   : > { %556 = vperm.xlu0 %1644, %v356_v3  }
  0x43   : > { %1645 = vset.pattern.permute.xlu1 %v1757_v11 }
  0x44   : > { %548 = vperm.xlu1 %1645, %v354_v4  }
  0x48   : > { %552 = vperm.xlu1 %1645, %v355_v0  }
  0x98   : > { %v381_v13 = vpop.permute.xlu1 %380  ;;  %v371_v14 = vpop.permute.xlu0 %370 }
  0x99   : > { %v407_v52 = vmul.f32 %v402_v43, %v371_v14  ;;  %v408_v53 = vmul.f32 %v406_v44, %v371_v14  ;;  %v411_v57 = vmul.f32 %v402_v43, %v381_v13  ;;  %v412_v58 = vmul.f32 %v406_v44, %v381_v13 }
  0x9c   : > { %v386_v15 = vpop.permute.xlu1 %385  ;;  %v376_v16 = vpop.permute.xlu0 %375 }
  0x9d   : > { %v409_v50 = vmul.f32 %v402_v43, %v376_v16  ;;  %v410_v51 = vmul.f32 %v406_v44, %v376_v16  ;;  %v413_v61 = vmul.f32 %v402_v43, %v386_v15  ;;  %v414_v62 = vmul.f32 %v406_v44, %v386_v15 }
  0xa0   : > { %v1906_v17 = vpop.permute.xlu1 %422  ;;  %v1908_v18 = vpop.permute.xlu0 %417 }
  0xa1   : > { %v437_v1 = vsub.f32 %v1906_v17, %v409_v50  ;;  %v438_v2 = vsub.f32 %v1906_v17, %v410_v51  ;;  %v435_v6 = vsub.f32 %v1908_v18, %v407_v52  ;;  %v436_v7 = vsub.f32 %v1908_v18, %v408_v53 }
  0xa4   : > { %v1910_v20 = vpop.permute.xlu1 %432  ;;  %v1912_v21 = vpop.permute.xlu0 %427 }
  0xa5   : > { %v441_v11 = vsub.f32 %v1910_v20, %v413_v61  ;;  %v442_v13 = vsub.f32 %v1910_v20, %v414_v62  ;;  %v439_v14 = vsub.f32 %v1912_v21, %v411_v57  ;;  %v440_v15 = vsub.f32 %v1912_v21, %v412_v58 }
  0xa9   : > { %v449_v23 = vpop.permute.xlu1 %448  ;;  %v445_v24 = vpop.permute.xlu0 %444 }
  0xaa   : > { %v479_v63 = vmul.f32 %v472_v48, %v449_v23  ;;  %v480_v0 = vmul.f32 %v476_v49, %v449_v23  ;;  %v477_v3 = vmul.f32 %v472_v48, %v445_v24  ;;  %v478_v4 = vmul.f32 %v476_v49, %v445_v24 }
  0xac   : > { %v487_v16 = vsub.f32 %v437_v1, %v479_v63  ;;  %v488_v17 = vsub.f32 %v438_v2, %v480_v0  ;;  %v485_v25 = vsub.f32 %v435_v6, %v477_v3  ;;  %v486_v26 = vsub.f32 %v436_v7, %v478_v4 }
  0xad   : > { %v453_v30 = vpop.permute.xlu1 %452  ;;  %v457_v31 = vpop.permute.xlu0 %456 }
  0xae   : > { %v481_v8 = vmul.f32 %v472_v48, %v453_v30  ;;  %v482_v9 = vmul.f32 %v476_v49, %v453_v30  ;;  %v483_v23 = vmul.f32 %v472_v48, %v457_v31  ;;  %v484_v24 = vmul.f32 %v476_v49, %v457_v31 }
  0xb0   : > { %v489_v18 = vsub.f32 %v439_v14, %v481_v8  ;;  %v490_v32 = vsub.f32 %v440_v15, %v482_v9  ;;  %v491_v39 = vsub.f32 %v441_v11, %v483_v23  ;;  %v492_v21 = vsub.f32 %v442_v13, %v484_v24 }
  0xb2   : > { %v495_v40 = vpop.permute.xlu1 %494  ;;  %v499_v45 = vpop.permute.xlu0 %498 }
  0xb3   : > { %v529_v28 = vmul.f32 %v522_v54, %v499_v45  ;;  %v530_v29 = vmul.f32 %v526_v55, %v499_v45  ;;  %v527_v34 = vmul.f32 %v522_v54, %v495_v40  ;;  %v528_v35 = vmul.f32 %v526_v55, %v495_v40 }
  0xb5   : > { %v537_v43 = vsub.f32 %v487_v16, %v529_v28  ;;  %v538_v31 = vsub.f32 %v488_v17, %v530_v29  ;;  %v535_v50 = vsub.f32 %v485_v25, %v527_v34  ;;  %v536_v51 = vsub.f32 %v486_v26, %v528_v35 }
  0xb6   : > { %v503_v56 = vpop.permute.xlu1 %502  ;;  %v365_v17 = vadd.s32 16, %v1916_v22  ;;  %v364_v25 = vadd.s32 8, %v1916_v22  ;;  %v366_v26 = vadd.s32 24, %v1916_v22 }
  0xb7   : > { %v545_v5 = vpop.permute.xlu0 %544  ;;  %v531_v36 = vmul.f32 %v522_v54, %v503_v56  ;;  %v532_v20 = vmul.f32 %v526_v55, %v503_v56 }
  0xb8   : > { %v577_v44 = vmul.f32 %v572_v59, %v545_v5  ;;  %v578_v46 = vmul.f32 %v576_v60, %v545_v5 }
  0xb9   : > { %v539_v52 = vsub.f32 %v489_v18, %v531_v36  ;;  %v540_v40 = vsub.f32 %v490_v32, %v532_v20 }
  0xba   : > { %v507_v10 = vpop.permute.xlu1 %506  ;;  %v585_v58 = vsub.f32 %v535_v50, %v577_v44  ;;  %v586_v61 = vsub.f32 %v536_v51, %v578_v46 }
  0xbb   : > { %v533_v30 = vmul.f32 %v522_v54, %v507_v10  ;;  %v534_v33 = vmul.f32 %v526_v55, %v507_v10  ;;  %v557_v37 = vpop.permute.xlu0 %556 }
  0xbc   : > { %v583_v48 = vmul.f32 %v572_v59, %v557_v37  ;;  %v584_v49 = vmul.f32 %v576_v60, %v557_v37 }
  0xbd   : > { %v541_v47 = vsub.f32 %v491_v39, %v533_v30  ;;  %v542_v45 = vsub.f32 %v492_v21, %v534_v33  ;;  %v361_v30 = vld [vmem:[%s2319_s3] sm:$0xf] }
  0xbe   : > { %v703_v36 = vsel %vm701_vm1, %v361_v30, 0 }
  0xbf   : > { %v549_v38 = vpop.permute.xlu1 %548  ;;  %v591_v62 = vsub.f32 %v541_v47, %v583_v48  ;;  %v592_v63 = vsub.f32 %v542_v45, %v584_v49 }
  0xc0   : > { %v579_v41 = vmul.f32 %v572_v59, %v549_v38  ;;  %v580_v42 = vmul.f32 %v576_v60, %v549_v38 }
  0xc2   : > { %v587_v54 = vsub.f32 %v537_v43, %v579_v41  ;;  %v588_v55 = vsub.f32 %v538_v31, %v580_v42  ;;  %v1988_v42 = vand.u32 4294901760, %v703_v36 }
  0xc3   : > { %v553_v53 = vpop.permute.xlu1 %552 }
  0xc4   : > { %v581_v56 = vmul.f32 %v572_v59, %v553_v53  ;;  %v582_v57 = vmul.f32 %v576_v60, %v553_v53  ;;  %v594_v2 = vmin.f32 %v587_v54, %v591_v62  ;;  %v603_v3 = vmin.f32 %v588_v55, %v592_v63 }
  0xc5   : > { %v1991_v47 = vsub.f32 %v703_v36, %v1988_v42 }
  0xc6   : > { %v589_v0 = vsub.f32 %v539_v52, %v581_v56  ;;  %v590_v1 = vsub.f32 %v540_v40, %v582_v57  ;;  %v1759_v56 = vmov 1966171168  }
  0xc7   : > { %v780_v51 = vand.u32 4294901760, %v1991_v47  ;;  %v659_v57 = vunpack.c.l.s4 %v1759_v56 }
  0xc8   : > { %v593_v4 = vmin.f32 %v585_v58, %v589_v0  ;;  %v602_v5 = vmin.f32 %v586_v61, %v590_v1 }
  0xca   : > { %v595_v6 = vmin.f32 %v593_v4, %v594_v2  ;;  %v604_v7 = vmin.f32 %v602_v5, %v603_v3 }
  0xcc   : > { %v596_v8 = vrot.slane %v595_v6, 4  ;;  %v605_v9 = vrot.slane %v604_v7, 4 }
  0xce   : > { %v597_v10 = vmin.f32 %v595_v6, %v596_v8  ;;  %v606_v11 = vmin.f32 %v604_v7, %v605_v9 }
  0xd0   : > { %v598_v13 = vrot.slane %v597_v10, 2  ;;  %v607_v14 = vrot.slane %v606_v11, 2 }
  0xd2   : > { %v599_v59 = vmin.f32 %v597_v10, %v598_v13  ;;  %v608_v60 = vmin.f32 %v606_v11, %v607_v14 }
  0xd4   : > { %v600_v15 = vrot.slane %v599_v59, 1  ;;  %v609_v16 = vrot.slane %v608_v60, 1 }
  0xd6   : > { %v601_v23 = vmin.f32 %v599_v59, %v600_v15  ;;  %v610_v24 = vmin.f32 %v608_v60, %v609_v16 }
  0xd8   : > { %vm611_vm2 = vcmp.eq.f32.partialorder %v585_v58, %v601_v23  ;;  %vm612_vm3 = vcmp.eq.f32.partialorder %v586_v61, %v610_v24  ;;  %vm615_vm4 = vcmp.eq.f32.partialorder %v589_v0, %v601_v23  ;;  %vm616_vm5 = vcmp.eq.f32.partialorder %v590_v1, %v610_v24 }
  0xd9   : > { %v1951_v28 = vsel %vm611_vm2, %v1916_v22, 32  ;;  %v1954_v29 = vsel %vm612_vm3, %v1916_v22, 32  ;;  %v1956_v18 = vsel %vm615_vm4, %v365_v17, 32  ;;  %v1958_v32 = vsel %vm616_vm5, %v365_v17, 32 }
  0xda   : > { %vm627_vm6 = vcmp.lt.s32.totalorder %v1951_v28, %v1956_v18  ;;  %vm642_vm7 = vcmp.lt.s32.totalorder %v1954_v29, %v1958_v32  ;;  %vm614_vm8 = vcmp.eq.f32.partialorder %v588_v55, %v610_v24  ;;  %vm618_vm9 = vcmp.eq.f32.partialorder %v592_v63, %v610_v24 }
  0xdb   : > { %v643_v33 = vsel %vm642_vm7, %v1954_v29, %v1958_v32  ;;  %v1969_v34 = vsel %vm614_vm8, %v364_v25, 32  ;;  %v1971_v35 = vsel %vm618_vm9, %v366_v26, 32  ;;  %vm613_vm11 = vcmp.eq.f32.partialorder %v587_v54, %v601_v23 }
  0xdc   : > { %vm644_vm10 = vcmp.lt.s32.totalorder %v1969_v34, %v1971_v35  ;;  %vm617_vm12 = vcmp.eq.f32.partialorder %v591_v62, %v601_v23  ;;  %v628_v20 = vsel %vm627_vm6, %v1951_v28, %v1956_v18  ;;  %v1980_v38 = vsel %vm613_vm11, %v364_v25, 32 }
  0xdd   : > { %v645_v37 = vsel %vm644_vm10, %v1969_v34, %v1971_v35  ;;  %v1982_v39 = vsel %vm617_vm12, %v366_v26, 32  ;;  %v781_v55 = vsub.f32 %v1991_v47, %v780_v51  ;;  %v1760_v58 = vmov 1.0  }
  0xde   : > { %vm646_vm13 = vcmp.lt.s32.totalorder %v643_v33, %v645_v37  ;;  %vm629_vm14 = vcmp.lt.s32.totalorder %v1980_v38, %v1982_v39  ;;  %v660_v17 = vunpack.c.0.s8 %v659_v57 }
  0xdf   : > { %v647_v21 = vsel %vm646_vm13, %v643_v33, %v645_v37  ;;  %v630_v41 = vsel %vm629_vm14, %v1980_v38, %v1982_v39  ;;  %v782_v6 = vand.u32 4294901760, %v781_v55 }
  0xe0   : > { %v648_v43 = vrot.slane %v647_v21, 4  ;;  %vm631_vm15 = vcmp.lt.s32.totalorder %v628_v20, %v630_v41 }
  0xe1   : > { %v632_v31 = vsel %vm631_vm15, %v628_v20, %v630_v41  ;;  %vm674_vm15 = vcmp.lt.s32.totalorder %v362_v19, 256  ;;  %v1294_v19 = vld [vmem:[%s1892_s22] sm:$0xff] }
  0xe2   : > { %vm649_vm1 = vcmp.lt.s32.totalorder %v647_v21, %v648_v43  ;;  %v633_v44 = vrot.slane %v632_v31, 4 }
  0xe3   : > { %v650_v46 = vsel %vm649_vm1, %v647_v21, %v648_v43  ;;  %vm1275_vm1 = vcmask 1043456  }
  0xe4   : > { %v651_v45 = vrot.slane %v650_v46, 2  ;;  %vm634_vm2 = vcmp.lt.s32.totalorder %v632_v31, %v633_v44 }
  0xe5   : > { %v635_v48 = vsel %vm634_vm2, %v632_v31, %v633_v44  ;;  %v663_v44 = vsub.s32 %v660_v17, %v1916_v22  ;;  %vm346_vm2 = vcmask 0  }
  0xe6   : > { %vm652_vm3 = vcmp.lt.s32.totalorder %v650_v46, %v651_v45  ;;  %v636_v49 = vrot.slane %v635_v48, 2  ;;  %347 = vst.msk [vmem:[%s2234_s8] sm:$0x1] %vm346_vm2, %v1758_v12 }
  0xe7   : > { %v653_v50 = vsel %vm652_vm3, %v650_v46, %v651_v45 }
  0xe8   : > { %v654_v52 = vrot.slane %v653_v50, 1  ;;  %vm637_vm4 = vcmp.lt.s32.totalorder %v635_v48, %v636_v49 }
  0xe9   : > { %v638_v40 = vsel %vm637_vm4, %v635_v48, %v636_v49 }
  0xea   : > { %vm655_vm5 = vcmp.lt.s32.totalorder %v653_v50, %v654_v52  ;;  %v639_v53 = vrot.slane %v638_v40, 1 }
  0xeb   : > { %v1994_v54 = vsel %vm655_vm5, %v653_v50, %v654_v52 }
  0xec   : > { %vm684_vm6 = vcmp.eq.s32.totalorder %v1971_v35, %v1994_v54  ;;  %vm640_vm7 = vcmp.lt.s32.totalorder %v638_v40, %v639_v53  ;;  %vm678_vm8 = vcmp.eq.s32.totalorder %v1954_v29, %v1994_v54  ;;  %vm682_vm9 = vcmp.eq.s32.totalorder %v1958_v32, %v1994_v54 }
  0xed   : > { %1533 = vmatprep.subr.msk.mxu0 %vm684_vm6, %v1760_v58  ;;  %v2007_v61 = vsel %vm640_vm7, %v638_v40, %v639_v53  ;;  %v1526_v62 = vsel %vm678_vm8, 1.0, %v1758_v12  ;;  %vm680_vm10 = vcmp.eq.s32.totalorder %v1969_v34, %v1994_v54  ;;  %v1532_v63 = vsel %vm684_vm6, 1.0, %v1758_v12  ;;  %v1295_v34 = vld [vmem:[%s1892_s22 + $0x8] sm:$0xff] }
  0xee   : > { %vm683_vm11 = vcmp.eq.s32.totalorder %v1982_v39, %v2007_v61  ;;  %vm681_vm12 = vcmp.eq.s32.totalorder %v1956_v18, %v2007_v61  ;;  %vm677_vm13 = vcmp.eq.s32.totalorder %v1951_v28, %v2007_v61  ;;  %vm679_vm14 = vcmp.eq.s32.totalorder %v1980_v38, %v2007_v61  ;;  %v1297_v39 = vld [vmem:[%s1892_s22 + $0x18] sm:$0xff] }
  0xef   : > { %v1531_v0 = vsel %vm683_vm11, 1.0, %v1758_v12  ;;  %1534 = vmatpush1.msk.msra.mxu0 %vm683_vm11, %v1760_v58  ;;  %v1529_v1 = vsel %vm681_vm12, 1.0, %v1758_v12  ;;  %v1525_v2 = vsel %vm677_vm13, 1.0, %v1758_v12  ;;  %v1527_v4 = vsel %vm679_vm14, 1.0, %v1758_v12 }
  0xf0   : > { %1535 = vmatprep.subr.msk.mxu0 %vm682_vm9, %v1760_v58  ;;  %v1257_v3 = vadd.f32 %v1526_v62, %v1525_v2  ;;  %v1528_v5 = vsel %vm680_vm10, 1.0, %v1758_v12  ;;  %v2061_v7 = vsub.f32 %v1526_v62, %v1526_v62  ;;  %v2065_v9 = vsub.f32 %v1527_v4, %v1527_v4 }
  0xf1   : > { %1536 = vmatpush1.msk.msra.mxu0 %vm681_vm12, %v1760_v58  ;;  %v2063_v8 = vsub.f32 %v1528_v5, %v1528_v5  ;;  %v2067_v10 = vsub.f32 %v1532_v63, %v1532_v63  ;;  %v2069_v11 = vsub.f32 %v1525_v2, %v1525_v2  ;;  %v2075_v13 = vsub.f32 %v1531_v0, %v1531_v0 }
  0xf2   : > { %1258 = vadd.xlane.f32.xlu0 %v1257_v3  ;;  %1537 = vmatprep.subr.msk.mxu0 %vm680_vm10, %v1760_v58  ;;  %v1530_v14 = vsel %vm682_vm9, 1.0, %v1758_v12  ;;  %v2081_v59 = vsub.f32 %v1529_v1, %v1529_v1  ;;  %v1260_v23 = vadd.f32 %v1528_v5, %v1527_v4  ;;  %v845_v26 = vand.u32 4294901760, %v2065_v9 }
  0xf3   : > { %1538 = vmatpush1.msk.msra.mxu0 %vm679_vm14, %v1760_v58  ;;  %v815_v60 = vand.u32 4294901760, %v2067_v10  ;;  %v2088_v15 = vsub.f32 %v1530_v14, %v1530_v14  ;;  %v839_v16 = vand.u32 4294901760, %v2063_v8  ;;  %v821_v24 = vand.u32 4294901760, %v2075_v13 }
  0xf4   : > { %1539 = vmatprep.subr.msk.mxu0 %vm678_vm8, %v1760_v58  ;;  %v833_v25 = vand.u32 4294901760, %v2081_v59  ;;  %v851_v36 = vand.u32 4294901760, %v2061_v7  ;;  %v857_v21 = vand.u32 4294901760, %v2069_v11  ;;  %v1266_v45 = vadd.f32 %v1532_v63, %v1531_v0 }
  0xf5   : > { %1540 = vmatpush1.msk.msra.mxu0 %vm677_vm13, %v1760_v58  ;;  %v816_v30 = vsub.f32 %v2067_v10, %v815_v60  ;;  %v827_v33 = vand.u32 4294901760, %v2088_v15  ;;  %v822_v20 = vsub.f32 %v2075_v13, %v821_v24  ;;  %v840_v31 = vsub.f32 %v2063_v8, %v839_v16 }
  0xf6   : > { %1261 = vadd.xlane.f32.xlu0 %v1260_v23  ;;  %927 = vmatprep.subr.mxu0 %v2067_v10  ;;  %v834_v37 = vsub.f32 %v2081_v59, %v833_v25  ;;  %v846_v48 = vsub.f32 %v2065_v9, %v845_v26  ;;  %v852_v50 = vsub.f32 %v2061_v7, %v851_v36 }
  0xf7   : > { %783 = vmatmul.mubr.f32.vlgmr.msra.gmra.mxu0 %v782_v6  ;;  %v817_v41 = vand.u32 4294901760, %v816_v30  ;;  %v828_v43 = vsub.f32 %v2088_v15, %v827_v33  ;;  %v823_v46 = vand.u32 4294901760, %v822_v20  ;;  %v2124_v52 = vadd.f32 %v1530_v14, %v1529_v1 }
  0xf8   : > { %930 = vmatpush1.msra.mxu0 %v2075_v13  ;;  %981 = vmatprep.mubr.f32.mxu0 %v1758_v12  ;;  %v657_v22 = vcombine.low %v2007_v61, %v1994_v54  ;;  %v835_v40 = vand.u32 4294901760, %v834_v37  ;;  %v858_v53 = vsub.f32 %v2069_v11, %v857_v21  ;;  %v841_v55 = vand.u32 4294901760, %v840_v31 }
  0xf9   : > { %818 = vmatprep.subr.mxu1 %v817_v41  ;;  %933 = vmatprep.subr.mxu0 %v2088_v15  ;;  %v829_v49 = vand.u32 4294901760, %v828_v43  ;;  %v847_v57 = vand.u32 4294901760, %v846_v48  ;;  %v853_v62 = vand.u32 4294901760, %v852_v50 }
  0xfa   : > { %824 = vmatpush1.msra.mxu1 %v823_v46  ;;  %936 = vmatpush1.msra.mxu0 %v2081_v59  ;;  %v664_v56 = vrot.slane %v657_v22, %v663_v44  ;;  %v859_v0 = vand.u32 4294901760, %v858_v53 }
  0xfb   : > { %830 = vmatprep.subr.mxu1 %v829_v49  ;;  %1267 = vadd.xlane.f32.xlu0 %v1266_v45 }
  0xfc   : > { %836 = vmatpush1.msra.mxu1 %v835_v40  ;;  %939 = vmatprep.subr.mxu0 %v2063_v8  ;;  %v671_v63 = vrot.slane %v664_v56, %v663_v44 }
  0xfd   : > { %842 = vmatprep.subr.mxu1 %v841_v55  ;;  %942 = vmatpush1.msra.mxu0 %v2065_v9 }
  0xfe   : > { %848 = vmatpush1.msra.mxu1 %v847_v57  ;;  %945 = vmatprep.subr.mxu0 %v2061_v7  ;;  %676 = vst.msk [vmem:[%s2136_s19] sm:$0x3] %vm674_vm15, %v671_v63 }
  0xff   : > { %854 = vmatprep.subr.mxu1 %v853_v62  ;;  %948 = vmatpush1.msra.mxu0 %v2069_v11 }
 0x100   : > { %860 = vmatpush1.msra.mxu1 %v859_v0  ;;  %1099 = vmatprep.subr.mxu0 %v815_v60  ;;  %v1253_v60 = vcombine.high %v1923_v27, %v1923_v27 }
 0x101   : > { %895 = vmatmul.mubr.f32.vlgmr.msra.gmra.mxu1 %v1988_v42  ;;  %984 = vmatmul.mubr.f32.vlgmr.msra.gmra.mxu0 %v1991_v47 }
 0x102   : > { %1541 = vmatprep.subr.msk.mxu1 %vm684_vm6, %v1760_v58  ;;  %1103 = vmatpush1.msra.mxu0 %v821_v24 }
 0x103   : > { %1542 = vmatpush1.msk.msra.mxu1 %vm683_vm11, %v1760_v58  ;;  %1107 = vmatprep.subr.mxu0 %v827_v33 }
 0x104   : > { %1543 = vmatprep.subr.msk.mxu1 %vm682_vm9, %v1760_v58  ;;  %1111 = vmatpush1.msra.mxu0 %v833_v25 }
 0x105   : > { %1544 = vmatpush1.msk.msra.mxu1 %vm681_vm12, %v1760_v58  ;;  %1115 = vmatprep.subr.mxu0 %v839_v16 }
 0x106   : > { %1545 = vmatprep.subr.msk.mxu1 %vm680_vm10, %v1760_v58  ;;  %1119 = vmatpush1.msra.mxu0 %v845_v26 }
 0x107   : > { %1546 = vmatpush1.msk.msra.mxu1 %vm679_vm14, %v1760_v58  ;;  %1123 = vmatprep.subr.mxu0 %v851_v36 }
 0x108   : > { %1547 = vmatprep.subr.msk.mxu1 %vm678_vm8, %v1760_v58  ;;  %1127 = vmatpush1.msra.mxu0 %v857_v21 }
 0x109   : > { %1548 = vmatpush1.msk.msra.mxu1 %vm677_vm13, %v1760_v58  ;;  %1062 = vmatprep.mubr.f32.mxu1 %v1758_v12 }
 0x10a   : > { %1066 = vmatmul.mubr.f32.vlgmr.msra.gmra.mxu1 %v780_v51  ;;  %1549 = vmatprep.subr.msk.mxu1 %vm684_vm6, %v1760_v58 }
 0x10b   : > { %1160 = vmatprep.mubr.f32.mxu0 %v1758_v12  ;;  %1550 = vmatpush1.msk.msra.mxu1 %vm683_vm11, %v1760_v58 }
 0x10c   : > { %1162 = vmatmul.mubr.f32.vlgmr.msra.gmra.mxu0 %v1988_v42  ;;  %1551 = vmatprep.subr.msk.mxu1 %vm682_vm9, %v1760_v58 }
 0x10d   : > { %1552 = vmatpush1.msk.msra.mxu1 %vm681_vm12, %v1760_v58  ;;  %1240 = vmatprep.mubr.f32.mxu1 %v1758_v12 }
 0x10e   : > { %1553 = vmatprep.subr.msk.mxu1 %vm680_vm10, %v1760_v58 }
 0x10f   : > { %1554 = vmatpush1.msk.msra.mxu1 %vm679_vm14, %v1760_v58 }
 0x110   : > { %1555 = vmatprep.subr.msk.mxu1 %vm678_vm8, %v1760_v58 }
 0x111   : > { %1556 = vmatpush1.msk.msra.mxu1 %vm677_vm13, %v1760_v58 }
 0x112   : > { %1242 = vmatmul.mubr.f32.vlgmr.msra.gmra.mxu1 %v1988_v42 }
 0x17b   : > { %v1259_v18 = vpop.xlane.xlu0 %1258 }
 0x17c   : > { %v1298_v32 = vadd.f32 %v1294_v19, %v1259_v18 }
 0x17e   : > { %1303 = vst.msk [vmem:[%s1892_s22] sm:$0xff] %vm348_vm0, %v1298_v32 }
 0x17f   : > { %v1262_v35 = vpop.xlane.xlu0 %1261 }
 0x180   : > { %v1299_v38 = vadd.f32 %v1295_v34, %v1262_v35 }
 0x182   : > { %1304 = vst.msk [vmem:[%s1892_s22 + $0x8] sm:$0xff] %vm348_vm0, %v1299_v38 }
 0x184   : > { %v1268_v29 = vpop.xlane.xlu0 %1267 }
 0x185   : > { %v1301_v47 = vadd.f32 %v1297_v39, %v1268_v29 }
 0x187   : > { %1306 = vst.msk [vmem:[%s1892_s22 + $0x18] sm:$0xff] %vm348_vm0, %v1301_v47 }
 0x1b7   : > { %v784_v51 = vpop.f32.mrf.mxu0 }
 0x1b9   : > { %v786_v28 = vpop.f32.mrf.mxu0 }
 0x1c1   : > { %v896_v54 = vpop.f32.mrf.mxu1  ;;  %v985_v42 = vpop.f32.mrf.mxu0 }
 0x1c2   : > { %v897_v61 = vadd.f32 %v896_v54, %v784_v51 }
 0x1c3   : > { %v898_v58 = vpop.f32.mrf.mxu1  ;;  %v987_v2 = vpop.f32.mrf.mxu0 }
 0x1c4   : > { %v899_v1 = vadd.f32 %v898_v58, %v786_v28  ;;  %v986_v4 = vadd.f32 %v985_v42, %v897_v61 }
 0x1c6   : > { %v988_v7 = vadd.f32 %v987_v2, %v899_v1 }
 0x1ca   : > { %v1067_v3 = vpop.f32.mrf.mxu1 }
 0x1cb   : > { %v1068_v8 = vadd.f32 %v1067_v3, %v986_v4 }
 0x1cc   : > { %v1069_v5 = vpop.f32.mrf.mxu1  ;;  %v1163_v6 = vpop.f32.mrf.mxu0 }
 0x1cd   : > { %v1070_v9 = vadd.f32 %v1069_v5, %v988_v7  ;;  %v1164_v11 = vadd.f32 %v1163_v6, %v1068_v8 }
 0x1ce   : > { %v1165_v10 = vpop.f32.mrf.mxu0 }
 0x1cf   : > { %v1166_v14 = vadd.f32 %v1165_v10, %v1070_v9 }
 0x1d2   : > { %v1243_v13 = vpop.f32.mrf.mxu1 }
 0x1d3   : > { %v1244_v59 = vadd.f32 %v1243_v13, %v1164_v11 }
 0x1d4   : > { %v1245_v15 = vpop.f32.mrf.mxu1 }
 0x1d5   : > { %v1255_v16 = vsub.f32 %v1244_v59, %v1923_v27  ;;  %v1246_v17 = vadd.f32 %v1245_v15, %v1166_v14 }
 0x1d7   : > { %v1273_v23 = vmul.f32 %v1255_v16, %v1255_v16  ;;  %v1250_v24 = vcombine.low %v1244_v59, %v1246_v17  ;;  %v1256_v25 = vsub.f32 %v1246_v17, %v1253_v60 }
 0x1d9   : > { %v1274_v26 = vmul.f32 %v1256_v25, %v1256_v25  ;;  %1252 = vst [vmem:[%s302_s21] sm:$0xff] %v1250_v24  ;;  %v1276_v30 = vsel %vm1275_vm1, %v1273_v23, 0.0 }
 0x1db   : > { %v1277_v33 = vsel %vm1275_vm1, %v1274_v26, 0.0 }
 0x1dc   : > { %v1278_v36 = vadd.f32 %v1277_v33, %v1276_v30 }
 0x1de   : > { %1279 = vadd.xlane.f32.xlu1 %v1278_v36 }
 0x1e2   : > { %1264 = vadd.xlane.f32.xlu1 %v2124_v52 }
 0x1e3   : > { %1659 = shalt.err (!%p1656_p5)
}
 0x1e4   : > { %s1660_s2 = scalar_lea.hbm %s1335_s17, 128  ;;  %s1664_s12 = scalar_lea.hbm %s2306_s4, 256 }
 0x1e5   : > { %p1661_p6 = scmp.ne.s32.totalorder %s1335_s17, %s1660_s2  ;;  %p1665_p10 = scmp.lt.s32.totalorder %s1335_s17, %s2306_s4 }
 0x1e6   : > { %p1666_p11 = scmp.lt.s32.totalorder %s1664_s12, %s1660_s2 }
 0x1e7   : > { %p1662_p7 = pnand %p1661_p6, %p1843_p4 }
 0x1e8   : > { %p1667_p12 = por %p1666_p11, %p1665_p10 }
 0x1e9   : > { %p1663_p9 = pneg %p1662_p7 }
 0x1eb   : > { %p1668_p13 = pnand %p1667_p12, %p1663_p9 }
 0x1ed   : > { %1671 = shalt.err (!%p1668_p13)
}
 0x1ee   : > { %1571 = dma.vmem_to_hbm [thread:$0]  (%p1843_p4), %s1338_s20, 128, %s1335_s17, %s1308_s0  }
 0x1ef   : > { %s1568_s1 = sshll.u32 %s1744_s27, 5  ;;  %s1353_s18 = sshll.u32 %s2136_s19, 4  ;;  %s1354_s18 = int_to_ptr.vmem [resolvable:$true] %s1353_s18 }
 0x1f0   : > { %s1351_s21 = scalar_lea.hbm %s2307_s5, %s1568_s1  ;;  %s1313_s3 = scalar_lea.sflag [#allocation5], %s2110_s16 }
 0x1f1   : > { %s1672_s10 = scalar_lea.vmem %s1354_s18, 32  ;;  %s1762_s2 = smov [#allocation4]  }
 0x1f2   : > { %p1673_p0 = scmp.ne.s32.totalorder %s1354_s18, %s1672_s10  ;;  %s1676_s12 = sshll.u32 %s1762_s2, 4  ;;  %s1677_s12 = int_to_ptr.vmem [resolvable:$false] %s1676_s12 }
 0x1f3   : > { %s1678_s15 = scalar_lea.vmem %s1677_s12, 64  ;;  %p1679_p3 = scmp.lt.s32.totalorder %s1354_s18, %s1677_s12 }
 0x1f4   : > { %p1674_p1 = pnand %p1673_p0, %p1843_p4  ;;  %p1680_p5 = scmp.lt.s32.totalorder %s1678_s15, %s1672_s10 }
 0x1f6   : > { %p1675_p2 = pneg %p1674_p1  ;;  %p1681_p6 = por %p1680_p5, %p1679_p3 }
 0x1f8   : > { %p1682_p7 = pnand %p1681_p6, %p1675_p2 }
 0x1fa   : > { %1685 = shalt.err (!%p1682_p7)
}
 0x1fb   : > { %s1686_s0 = scalar_lea.hbm %s1351_s21, 32  ;;  %s1690_s19 = scalar_lea.hbm %s2307_s5, 64 }
 0x1fc   : > { %p1687_p9 = scmp.ne.s32.totalorder %s1351_s21, %s1686_s0  ;;  %p1691_p12 = scmp.lt.s32.totalorder %s1351_s21, %s2307_s5 }
 0x1fd   : > { %p1692_p13 = scmp.lt.s32.totalorder %s1690_s19, %s1686_s0 }
 0x1fe   : > { %p1688_p10 = pnand %p1687_p9, %p1843_p4 }
 0x1ff   : > { %p1693_p0 = por %p1692_p13, %p1691_p12 }
 0x200   : > { %p1689_p11 = pneg %p1688_p10 }
 0x202   : > { %p1694_p1 = pnand %p1693_p0, %p1689_p11 }
 0x204   : > { %1697 = shalt.err (!%p1694_p1)
}
 0x205   : > { %1572 = dma.vmem_to_hbm [thread:$0]  (%p1843_p4), %s1354_s18, 32, %s1351_s21, %s1313_s3   ;;  %v1296_v20 = vld [vmem:[%s1892_s22 + $0x10] sm:$0xff]  ;;  %v1290_v45 = vld [vmem:[%s2234_s8] sm:$0x1] }
 0x267   : > { %v1280_v12 = vpop.xlane.xlu1 %1279 }
 0x268   : > { %v1281_v27 = vrot.slane %v1280_v12, 4 }
 0x26a   : > { %v1282_v37 = vadd.f32 %v1281_v27, %v1280_v12 }
 0x26b   : > { %v1265_v21 = vpop.xlane.xlu1 %1264 }
 0x26c   : > { %v1283_v41 = vrot.slane %v1282_v37, 2  ;;  %v1300_v43 = vadd.f32 %v1296_v20, %v1265_v21 }
 0x26e   : > { %1305 = vst.msk [vmem:[%s1892_s22 + $0x10] sm:$0xff] %vm348_vm0, %v1300_v43  ;;  %v1284_v31 = vadd.f32 %v1283_v41, %v1282_v37 }
 0x270   : > { %v1285_v44 = vrot.slane %v1284_v31, 1 }
 0x272   : > { %v1286_v46 = vadd.f32 %v1285_v44, %v1284_v31 }
 0x274   : > { %1569 = vpush %v1286_v46 }
 0x2a5   : > { %s1570_s11 = spop %1569 }
 0x2a6   : > { %v1288_v48 = vstv %s1570_s11 }
 0x2a7   : > { %v1291_v49 = vadd.f32 %v1290_v45, %v1288_v48 }
 0x2a9   : > { %1293 = vst.msk [vmem:[%s2234_s8] sm:$0x1] %vm346_vm2, %v1291_v49 }
 0x2aa PF: > { %p1582_p4 = scmp.ge.s32.totalorder %s1752_s29, 2  ;;  %s1371_s1 = sand.u32 1, %s1732_s24  }
 0x2ab   : > { %s1372_s22 = scalar_lea.sflag [#allocation3], %s1371_s1 }
 0x2ac   : > { %p1576_p2 = pnand %p1582_p4, %p1850_p8 }
 0x2ae   : > { %p1577_p3 = pneg %p1576_p2 }
 0x2b0   : > { %1723 = dma.done.wait (%p1577_p3), %s1372_s22, 128  }
 0x2b1   : > { %1725 = vsyncadd (%p1577_p3), %s1372_s22, 4294967168  ;;  %s1381_s18 = scalar_lea.sflag [#allocation5], %s1371_s1 }
 0x2b2   : > { %1727 = dma.done.wait (%p1577_p3), %s1381_s18, 32  }
 0x2b3   : > { %1729 = vsyncadd (%p1577_p3), %s1381_s18, 4294967264  ;;  %s24_s29 = sadd.s32 1, %s1752_s29   ;;  %s2320_s24 = smov %s1736_s25 }
 0x2b4   : > { %p21_p5 = scmp.ge.s32.totalorder %s24_s29, 4   ;;  %s2321_s25 = smov %s1740_s26 }
 0x2b5   : > { %s2322_s26 = smov %s1856_s14  ;;  %s2323_s27 = smov %s1748_s28 }
 0x2b6   : > { %s2324_s28 = smov %s2326_s9  ;;  %23 = sbr.rel (!%p21_p5) target bundleno = 11 (0xb), region = 116 }
 0x2bb   :  { %1400 = vsyncpa [#allocation3], 1 }
 0x2bc   :  { %1402 = vsyncpa [#allocation3 + $0x1], 1 }
 0x2bd   :  { %1403 = vsyncpa [#allocation5], 1 }
 0x2be   :  { %1405 = vsyncpa [#allocation5 + $0x1], 1 }

</bundles_post_ra>
